<compile_context>
chip_gen: v7x
topology: tpu7x:2x2x1
jax: 0.10.0
libtpu: 0.0.40
codegen_flags: <defaults>
</compile_context>

<pallas_src>
import functools
import math

import jax
import jax.numpy as jnp
from jax.experimental import pallas as pl
from jax.experimental.pallas import tpu as pltpu


def _round_up(x, m):
    return (x + m - 1) // m * m


def _tpu_hw():
    """Returns (tensorcores_per_chip, physical_vmem_bytes) with safe fallbacks."""
    cores, vmem = 2, 64 << 20  # conservative (v7x-like) defaults
    try:
        info = pltpu.get_tpu_info()
        vmem = int(getattr(info, "vmem_capacity_bytes", vmem) or vmem)
        for name in ("num_cores", "num_cores_per_chip", "tensorcores_per_chip",
                     "num_tensorcores"):
            val = getattr(info, name, None)
            if val:
                cores = int(val)
                break
    except Exception:
        pass
    return cores, vmem


def _mixer_kernel(x_ref, wa_ref, ba_ref, wb_ref, bb_ref, o_ref, *, split):
    """One M-tile of the fused mixer.

    x_ref : (tm, S*T)          input slab (compute dtype)
    wa_ref: (S*T, S*O + S*D)   [block-diag(Wproj) | block-diag(BN-folded W1)]
    ba_ref: (1,   S*D)         BN-folded b1 (f32); proj bias rides on bb
    wb_ref: (S*D, S*O)         block-diag(W2)
    bb_ref: (1,   S*O)         b2 + tiled bp (f32)
    o_ref : (tm, S*O)          lane-dense output slab
    """
    x = x_ref[...]
    # One wide MXU pass: residual projection and the first mixer matmul fused
    # (split point SO is lane-aligned). f32 accumulation.
    y = jnp.dot(x, wa_ref[...], preferred_element_type=jnp.float32)
    proj = y[:, :split]                                # x @ Wp  (bp folded into bb)
    h = jnp.maximum(y[:, split:] + ba_ref[...], 0.0)   # ReLU(BN(x)@W1 + b1); dropout == id
    # Second mixer matmul (per-slot, block-diagonal) + (b2 + bp), then residual add.
    z = jnp.dot(h.astype(wb_ref.dtype), wb_ref[...],
                preferred_element_type=jnp.float32) + bb_ref[...]
    o_ref[...] = (proj + z).astype(o_ref.dtype)


def prepare_mixer_params(params, *, compute_dtype=jnp.bfloat16):
    """One-time (per model) weight packing: BN fold + block-diag layout + casts."""
    scale, shift, w1, b1, w2, b2, wp, bp = params
    S, T, D = w1.shape
    O = w2.shape[-1]
    # Same constraint PyTorch broadcasting imposes when adding b2 (S, d_model) to the
    # (..., S, output_channel) tensor.
    assert O == D and b2.shape == (S, D), (
        "ParamMixerBlock requires output_channel == d_model (b2 broadcast)")
    assert wp.shape == (T, O) and bp.shape == (O,)

    f32 = jnp.float32
    # ---- Fold BatchNorm2d (eval mode) into weight1 / bias1. ----
    w1f = w1.astype(f32) * scale.astype(f32)[None, :, None]                       # (S, T, D)
    b1f = b1.astype(f32) + jnp.einsum('t,std->sd', shift.astype(f32), w1.astype(f32))

    # ---- Block-structured weights: the whole S axis handled by one pair of lane-dense
    #      matmuls per M-tile; weights stay VMEM-resident across grid steps. ----
    eye = jnp.eye(S, dtype=f32)
    wp_bd = jnp.einsum('ij,to->itjo', eye, wp.astype(f32)).reshape(S * T, S * O)
    w1_bd = jnp.einsum('ij,itd->itjd', eye, w1f).reshape(S * T, S * D)
    wa = jnp.concatenate([wp_bd, w1_bd], axis=1).astype(compute_dtype)            # (ST, NA)
    wb = (jnp.einsum('ij,ido->idjo', eye, w2.astype(f32))
          .reshape(S * D, S * O).astype(compute_dtype))                           # (SD, SO)
    ba = b1f.reshape(1, S * D)                                                    # f32
    # bp folded into the second bias: out = x@Wp + bp + h@W2 + b2.
    bb = (b2.astype(f32).reshape(S * O) + jnp.tile(bp.astype(f32), S)).reshape(1, S * O)

    return dict(wa=wa, ba=ba, wb=wb, bb=bb, w1=w1, w2=w2,
                dims=(S, T, D, O), compute_dtype=jnp.dtype(compute_dtype))


def param_mixer_block(x, packed, *, out_dtype=jnp.bfloat16, tm_max=None):
    """x: (B, C, S, T) float32 with S = pool_size, T = input_channel.

    Returns (out, weight1, weight2) like ParamMixerBlock.forward (eval mode).
    """
    S, T, D, O = packed["dims"]
    compute_dtype = packed["compute_dtype"]
    wa, ba, wb, bb = packed["wa"], packed["ba"], packed["wb"], packed["bb"]

    B, C = x.shape[0], x.shape[1]
    assert x.shape == (B, C, S, T)
    M = B * C
    ST, SD, SO = S * T, S * D, S * O
    NA = SO + SD

    num_cores, vmem_cap = _tpu_hw()
    if tm_max is None:
        # 128-MiB-VMEM chips (v5e/v6e) tolerate a bigger tile than v7x (64 MiB).
        tm_max = 2048 if vmem_cap > (64 << 20) else 1024

    # bf16 packs 16 rows per sublane group; keep the M axis 16-aligned for 16-bit compute.
    pack = 16 if jnp.dtype(compute_dtype).itemsize == 2 else 8
    m_pack = _round_up(M, pack)
    tm = min(tm_max, m_pack)
    # Ensure the (parallel) M axis has >= num_cores grid steps so v7x's second TensorCore
    # gets work; no-op for single-TC chips or tiny M.
    if num_cores >= 2 and m_pack >= num_cores * pack:
        tm = min(tm, _round_up(pl.cdiv(m_pack, num_cores), pack))
    m_pad = _round_up(M, tm)

    # ---- Layout glue: pure contiguous reshape, no HBM transposes. ----
    x_flat = x.reshape(M, ST).astype(compute_dtype)
    if m_pad != M:
        x_flat = jnp.pad(x_flat, ((0, m_pad - M), (0, 0)))

    # ---- Explicit, generation-aware VMEM budget. ----
    in_bytes = jnp.dtype(compute_dtype).itemsize
    out_bytes = jnp.dtype(out_dtype).itemsize
    est = ((wa.size + wb.size) * in_bytes + (ba.size + bb.size) * 4   # resident weights
           + 2 * tm * ST * in_bytes + 2 * tm * SO * out_bytes          # double-buffered IO
           + 4 * tm * NA * 4)                                          # f32 intermediates
    vmem_limit = int(min(max(2 * est, 16 << 20), vmem_cap * 3 // 4))

    kernel = functools.partial(_mixer_kernel, split=SO)

    def build(weight_mode):
        def wspec(shape):
            if weight_mode is None:
                return pl.BlockSpec(shape, lambda i: (0, 0))
            return pl.BlockSpec(shape, lambda i: (0, 0), pipeline_mode=weight_mode)

        return pl.pallas_call(
            kernel,
            out_shape=jax.ShapeDtypeStruct((m_pad, SO), out_dtype),
            grid_spec=pltpu.PrefetchScalarGridSpec(
                num_scalar_prefetch=0,
                grid=(m_pad // tm,),
                in_specs=[
                    pl.BlockSpec((tm, ST), lambda i: (i, 0)),   # x slab (tiled over M)
                    wspec((ST, NA)),                            # fused [proj | W1']  (resident)
                    wspec((1, SD)),                             # folded b1           (resident)
                    wspec((SD, SO)),                            # block-diag W2       (resident)
                    wspec((1, SO)),                             # b2 + tiled bp       (resident)
                ],
                out_specs=pl.BlockSpec((tm, SO), lambda i: (i, 0)),  # lane-dense output
            ),
            compiler_params=pltpu.CompilerParams(
                dimension_semantics=("parallel",),
                vmem_limit_bytes=vmem_limit,
            ),
        )

    try:
        # Resident operands (constant index_map) only need a single VMEM copy.
        out_flat = build(pl.Buffered(1))(x_flat, wa, ba, wb, bb)
    except Exception:
        # Fallback for Pallas builds that reject single-buffered block specs.
        out_flat = build(None)(x_flat, wa, ba, wb, bb)

    out = out_flat[:M].reshape(B, C, S, O)
    return out, packed["w1"], packed["w2"]


def make_params(key, input_channel, d_model, output_channel, pool_size):
    """Deterministic synthetic init mirroring the PyTorch __init__ / init_parameter shapes."""
    ks = jax.random.split(key, 10)
    T, D, O, S = input_channel, d_model, output_channel, pool_size

    # kaiming_uniform_(a=sqrt(5)) bounds for 3-D tensors: bound = 1/sqrt(fan_in)
    b_w1 = 1.0 / math.sqrt(T * D)
    b_w2 = 1.0 / math.sqrt(D * O)
    w1 = jax.random.uniform(ks[0], (S, T, D), jnp.float32, -b_w1, b_w1)
    w2 = jax.random.uniform(ks[1], (S, D, O), jnp.float32, -b_w2, b_w2)

    # xavier_uniform_ bounds for the 2-D biases
    b_xav = math.sqrt(6.0 / (S + D))
    b1 = jax.random.uniform(ks[2], (S, D), jnp.float32, -b_xav, b_xav)
    b2 = jax.random.uniform(ks[3], (S, D), jnp.float32, -b_xav, b_xav)

    if T != O:
        # nn.Linear(input_channel, output_channel): weight stored transposed as (T, O)
        b_lin = 1.0 / math.sqrt(T)
        wp = jax.random.uniform(ks[4], (T, O), jnp.float32, -b_lin, b_lin)
        bp = jax.random.uniform(ks[5], (O,), jnp.float32, -b_lin, b_lin)
    else:
        # nn.Identity projection
        wp = jnp.eye(T, dtype=jnp.float32)
        bp = jnp.zeros((O,), jnp.float32)

    # BatchNorm2d(input_channel) eval-mode affine with NONTRIVIAL gamma/beta/running
    # stats so the BN -> weight fold is genuinely exercised (correctness review item).
    eps = 1e-5
    gamma = jax.random.uniform(ks[6], (T,), jnp.float32, 0.5, 1.5)
    beta = 0.1 * jax.random.normal(ks[7], (T,), jnp.float32)
    running_mean = 0.5 * jax.random.normal(ks[8], (T,), jnp.float32)
    running_var = jax.random.uniform(ks[9], (T,), jnp.float32, 0.5, 2.0)
    scale = gamma / jnp.sqrt(running_var + eps)
    shift = beta - running_mean * scale

    return scale, shift, w1, b1, w2, b2, wp, bp


def reference(x, params):
    scale, shift, w1, b1, w2, b2, wp, bp = params
    x_proj = x @ wp + bp
    y = x * scale + shift
    y = jnp.einsum('bcst,std->bcsd', y, w1) + b1
    y = jax.nn.relu(y)
    y = jnp.einsum('bcsd,sdt->bcst', y, w2) + b2
    return x_proj + y


if __name__ == "__main__":
    B, C = 2, 4
    input_channel, d_model, output_channel, pool_size = 16, 32, 32, 8

    key = jax.random.PRNGKey(0)
    kx, kp = jax.random.split(key)
    x = jax.random.normal(kx, (B, C, pool_size, input_channel), jnp.float32)
    params = make_params(kp, input_channel, d_model, output_channel, pool_size)

    ref = reference(x, params)

    # float32 compute / float32 output path (tight check; exercises the nontrivial BN fold).
    packed32 = prepare_mixer_params(params, compute_dtype=jnp.float32)
    out32, w1_out, w2_out = param_mixer_block(x, packed32, out_dtype=jnp.float32)
    jax.block_until_ready(out32)
    assert out32.shape == (B, C, pool_size, output_channel)
    assert jnp.allclose(out32, ref, atol=1e-2, rtol=1e-2), "f32 kernel mismatch vs reference"
    assert jnp.array_equal(w1_out, params[2]) and jnp.array_equal(w2_out, params[4])

    # bfloat16 compute / bfloat16 output fast path (perf-review default; relaxed tolerance).
    packed16 = prepare_mixer_params(params, compute_dtype=jnp.bfloat16)
    out16, _, _ = param_mixer_block(x, packed16, out_dtype=jnp.bfloat16)
    jax.block_until_ready(out16)
    assert out16.shape == (B, C, pool_size, output_channel)
    assert jnp.allclose(out16.astype(jnp.float32), ref, atol=8e-2, rtol=8e-2), \
        "bf16 kernel mismatch vs reference"

    print("KERNEL_OK")
</pallas_src>

<mosaic_0001>
module attributes {stable_mosaic.version = 11 : i64} {
  func.func @_mixer_kernel(%arg0: i32, %arg1: memref<8x128xf32, #tpu.memory_space<vmem>>, %arg2: memref<128x512xf32, #tpu.memory_space<vmem>>, %arg3: memref<1x256xf32, #tpu.memory_space<vmem>>, %arg4: memref<256x256xf32, #tpu.memory_space<vmem>>, %arg5: memref<1x256xf32, #tpu.memory_space<vmem>>, %arg6: memref<8x256xf32, #tpu.memory_space<vmem>>) attributes {dimension_semantics = [#tpu.dimension_semantics<parallel>], iteration_bounds = array<i64: 1>, scalar_prefetch = 0 : i64, scratch_operands = 0 : i64, tpu.core_type = #tpu.core_type<tc>, window_params = [{transform_indices = @transform_0, window_bounds = array<i64: 8, 128>}, {pipeline_mode = #tpu.pipeline_mode<synchronous>, transform_indices = @transform_1, window_bounds = array<i64: 128, 512>}, {pipeline_mode = #tpu.pipeline_mode<synchronous>, transform_indices = @transform_2, window_bounds = array<i64: 1, 256>}, {pipeline_mode = #tpu.pipeline_mode<synchronous>, transform_indices = @transform_3, window_bounds = array<i64: 256, 256>}, {pipeline_mode = #tpu.pipeline_mode<synchronous>, transform_indices = @transform_4, window_bounds = array<i64: 1, 256>}, {transform_indices = @transform_5, window_bounds = array<i64: 8, 256>}]} {
    %c0 = arith.constant 0 : index
    %c0_0 = arith.constant 0 : index
    %0 = vector.load %arg1[%c0, %c0_0] : memref<8x128xf32, #tpu.memory_space<vmem>>, vector<8x128xf32>
    %c0_1 = arith.constant 0 : index
    %c0_2 = arith.constant 0 : index
    %1 = vector.load %arg2[%c0_1, %c0_2] : memref<128x512xf32, #tpu.memory_space<vmem>>, vector<128x512xf32>
    %cst = arith.constant dense<0.000000e+00> : vector<8x512xf32>
    %2 = tpu.matmul %0, %1, %cst {dimension_numbers = #tpu.dot_dimension_numbers<[1], [0], [0], [1], [0, 0, 1, 1], [], []>} : vector<8x128xf32>, vector<128x512xf32>, vector<8x512xf32> -> vector<8x512xf32>
    %3 = vector.extract_strided_slice %2 {offsets = [0, 0], sizes = [8, 256], strides = [1, 1]} : vector<8x512xf32> to vector<8x256xf32>
    %4 = vector.extract_strided_slice %2 {offsets = [0, 256], sizes = [8, 256], strides = [1, 1]} : vector<8x512xf32> to vector<8x256xf32>
    %c0_3 = arith.constant 0 : index
    %c0_4 = arith.constant 0 : index
    %5 = vector.load %arg3[%c0_3, %c0_4] : memref<1x256xf32, #tpu.memory_space<vmem>>, vector<1x256xf32>
    %6 = vector.broadcast %5 : vector<1x256xf32> to vector<8x256xf32>
    %7 = arith.addf %4, %6 : vector<8x256xf32>
    %cst_5 = arith.constant 0.000000e+00 : f32
    %8 = vector.broadcast %cst_5 : f32 to vector<8x256xf32>
    %9 = arith.maximumf %7, %8 : vector<8x256xf32>
    %c0_6 = arith.constant 0 : index
    %c0_7 = arith.constant 0 : index
    %10 = vector.load %arg4[%c0_6, %c0_7] : memref<256x256xf32, #tpu.memory_space<vmem>>, vector<256x256xf32>
    %cst_8 = arith.constant dense<0.000000e+00> : vector<8x256xf32>
    %11 = tpu.matmul %9, %10, %cst_8 {dimension_numbers = #tpu.dot_dimension_numbers<[1], [0], [0], [1], [0, 0, 1, 1], [], []>} : vector<8x256xf32>, vector<256x256xf32>, vector<8x256xf32> -> vector<8x256xf32>
    %c0_9 = arith.constant 0 : index
    %c0_10 = arith.constant 0 : index
    %12 = vector.load %arg5[%c0_9, %c0_10] : memref<1x256xf32, #tpu.memory_space<vmem>>, vector<1x256xf32>
    %13 = vector.broadcast %12 : vector<1x256xf32> to vector<8x256xf32>
    %14 = arith.addf %11, %13 : vector<8x256xf32>
    %15 = arith.addf %3, %14 : vector<8x256xf32>
    %c0_11 = arith.constant 0 : index
    %c0_12 = arith.constant 0 : index
    %16 = vector.load %arg6[%c0_11, %c0_12] : memref<8x256xf32, #tpu.memory_space<vmem>>, vector<8x256xf32>
    tpu.vector_store %arg6[%c0_11, %c0_12], %15 {strides = array<i32>} : memref<8x256xf32, #tpu.memory_space<vmem>>, vector<8x256xf32>,
    return
  }
  func.func @transform_0(%arg0: i32) -> (i32, i32) {
    %c0_i32 = arith.constant 0 : i32
    %c0_i32_0 = arith.constant 0 : i32
    return %arg0, %c0_i32 : i32, i32
  }
  func.func @transform_1(%arg0: i32) -> (i32, i32) {
    %c0_i32 = arith.constant 0 : i32
    %c0_i32_0 = arith.constant 0 : i32
    %c0_i32_1 = arith.constant 0 : i32
    return %c0_i32, %c0_i32_0 : i32, i32
  }
  func.func @transform_2(%arg0: i32) -> (i32, i32) {
    %c0_i32 = arith.constant 0 : i32
    %c0_i32_0 = arith.constant 0 : i32
    %c0_i32_1 = arith.constant 0 : i32
    return %c0_i32, %c0_i32_0 : i32, i32
  }
  func.func @transform_3(%arg0: i32) -> (i32, i32) {
    %c0_i32 = arith.constant 0 : i32
    %c0_i32_0 = arith.constant 0 : i32
    %c0_i32_1 = arith.constant 0 : i32
    return %c0_i32, %c0_i32_0 : i32, i32
  }
  func.func @transform_4(%arg0: i32) -> (i32, i32) {
    %c0_i32 = arith.constant 0 : i32
    %c0_i32_0 = arith.constant 0 : i32
    %c0_i32_1 = arith.constant 0 : i32
    return %c0_i32, %c0_i32_0 : i32, i32
  }
  func.func @transform_5(%arg0: i32) -> (i32, i32) {
    %c0_i32 = arith.constant 0 : i32
    %c0_i32_0 = arith.constant 0 : i32
    return %arg0, %c0_i32 : i32, i32
  }
}

module attributes {stable_mosaic.version = 11 : i64} {
  func.func @_mixer_kernel(%arg0: i32, %arg1: memref<8x128xf32, #tpu.memory_space<vmem>>, %arg2: memref<128x512xf32, #tpu.memory_space<vmem>>, %arg3: memref<1x256xf32, #tpu.memory_space<vmem>>, %arg4: memref<256x256xf32, #tpu.memory_space<vmem>>, %arg5: memref<1x256xf32, #tpu.memory_space<vmem>>, %arg6: memref<8x256xf32, #tpu.memory_space<vmem>>) attributes {dimension_semantics = [#tpu.dimension_semantics<parallel>], iteration_bounds = array<i64: 1>, scalar_prefetch = 0 : i64, scratch_operands = 0 : i64, tpu.core_type = #tpu.core_type<tc>, window_params = [{transform_indices = @transform_0, window_bounds = array<i64: 8, 128>}, {pipeline_mode = #tpu.pipeline_mode<synchronous>, transform_indices = @transform_1, window_bounds = array<i64: 128, 512>}, {pipeline_mode = #tpu.pipeline_mode<synchronous>, transform_indices = @transform_2, window_bounds = array<i64: 1, 256>}, {pipeline_mode = #tpu.pipeline_mode<synchronous>, transform_indices = @transform_3, window_bounds = array<i64: 256, 256>}, {pipeline_mode = #tpu.pipeline_mode<synchronous>, transform_indices = @transform_4, window_bounds = array<i64: 1, 256>}, {transform_indices = @transform_5, window_bounds = array<i64: 8, 256>}]} {
    %c0 = arith.constant 0 : index
    %c0_0 = arith.constant 0 : index
    %0 = vector.load %arg1[%c0, %c0_0] : memref<8x128xf32, #tpu.memory_space<vmem>>, vector<8x128xf32>
    %c0_1 = arith.constant 0 : index
    %c0_2 = arith.constant 0 : index
    %1 = vector.load %arg2[%c0_1, %c0_2] : memref<128x512xf32, #tpu.memory_space<vmem>>, vector<128x512xf32>
    %cst = arith.constant dense<0.000000e+00> : vector<8x512xf32>
    %2 = tpu.matmul %0, %1, %cst {dimension_numbers = #tpu.dot_dimension_numbers<[1], [0], [0], [1], [0, 0, 1, 1], [], []>} : vector<8x128xf32>, vector<128x512xf32>, vector<8x512xf32> -> vector<8x512xf32>
    %3 = vector.extract_strided_slice %2 {offsets = [0, 0], sizes = [8, 256], strides = [1, 1]} : vector<8x512xf32> to vector<8x256xf32>
    %4 = vector.extract_strided_slice %2 {offsets = [0, 256], sizes = [8, 256], strides = [1, 1]} : vector<8x512xf32> to vector<8x256xf32>
    %c0_3 = arith.constant 0 : index
    %c0_4 = arith.constant 0 : index
    %5 = vector.load %arg3[%c0_3, %c0_4] : memref<1x256xf32, #tpu.memory_space<vmem>>, vector<1x256xf32>
    %6 = vector.broadcast %5 : vector<1x256xf32> to vector<8x256xf32>
    %7 = arith.addf %4, %6 : vector<8x256xf32>
    %cst_5 = arith.constant 0.000000e+00 : f32
    %8 = vector.broadcast %cst_5 : f32 to vector<8x256xf32>
    %9 = arith.maximumf %7, %8 : vector<8x256xf32>
    %c0_6 = arith.constant 0 : index
    %c0_7 = arith.constant 0 : index
    %10 = vector.load %arg4[%c0_6, %c0_7] : memref<256x256xf32, #tpu.memory_space<vmem>>, vector<256x256xf32>
    %cst_8 = arith.constant dense<0.000000e+00> : vector<8x256xf32>
    %11 = tpu.matmul %9, %10, %cst_8 {dimension_numbers = #tpu.dot_dimension_numbers<[1], [0], [0], [1], [0, 0, 1, 1], [], []>} : vector<8x256xf32>, vector<256x256xf32>, vector<8x256xf32> -> vector<8x256xf32>
    %c0_9 = arith.constant 0 : index
    %c0_10 = arith.constant 0 : index
    %12 = vector.load %arg5[%c0_9, %c0_10] : memref<1x256xf32, #tpu.memory_space<vmem>>, vector<1x256xf32>
    %13 = vector.broadcast %12 : vector<1x256xf32> to vector<8x256xf32>
    %14 = arith.addf %11, %13 : vector<8x256xf32>
    %15 = arith.addf %3, %14 : vector<8x256xf32>
    %c0_11 = arith.constant 0 : index
    %c0_12 = arith.constant 0 : index
    %16 = vector.load %arg6[%c0_11, %c0_12] : memref<8x256xf32, #tpu.memory_space<vmem>>, vector<8x256xf32>
    tpu.vector_store %arg6[%c0_11, %c0_12], %15 {strides = array<i32>} : memref<8x256xf32, #tpu.memory_space<vmem>>, vector<8x256xf32>,
    return
  }
  func.func @transform_0(%arg0: i32) -> (i32, i32) {
    %c0_i32 = arith.constant 0 : i32
    %c0_i32_0 = arith.constant 0 : i32
    return %arg0, %c0_i32 : i32, i32
  }
  func.func @transform_1(%arg0: i32) -> (i32, i32) {
    %c0_i32 = arith.constant 0 : i32
    %c0_i32_0 = arith.constant 0 : i32
    %c0_i32_1 = arith.constant 0 : i32
    return %c0_i32, %c0_i32_0 : i32, i32
  }
  func.func @transform_2(%arg0: i32) -> (i32, i32) {
    %c0_i32 = arith.constant 0 : i32
    %c0_i32_0 = arith.constant 0 : i32
    %c0_i32_1 = arith.constant 0 : i32
    return %c0_i32, %c0_i32_0 : i32, i32
  }
  func.func @transform_3(%arg0: i32) -> (i32, i32) {
    %c0_i32 = arith.constant 0 : i32
    %c0_i32_0 = arith.constant 0 : i32
    %c0_i32_1 = arith.constant 0 : i32
    return %c0_i32, %c0_i32_0 : i32, i32
  }
  func.func @transform_4(%arg0: i32) -> (i32, i32) {
    %c0_i32 = arith.constant 0 : i32
    %c0_i32_0 = arith.constant 0 : i32
    %c0_i32_1 = arith.constant 0 : i32
    return %c0_i32, %c0_i32_0 : i32, i32
  }
  func.func @transform_5(%arg0: i32) -> (i32, i32) {
    %c0_i32 = arith.constant 0 : i32
    %c0_i32_0 = arith.constant 0 : i32
    return %arg0, %c0_i32 : i32, i32
  }
}

</mosaic_0001>

<bundles_post_ra>
// kernel: tpu_custom_call.1
= control target key start
LH: loop header
LB: loop body
LE: loop exit
PB: predicated region body
PF: predicated region fallthrough
CT: control target
= control target key end

     0   :  { %10 = vsyncpa [#allocation3], 0  ;;  %s784_s0 = inlined_call_operand.hbm [shape: f32[8,128], index: 0, kind: input, shape index: {}]   ;;  %s785_s1 = inlined_call_operand.hbm [shape: f32[128,512], index: 1, kind: input, shape index: {}]   ;;  %s786_s2 = inlined_call_operand.vmem [shape: f32[1,256], index: 2, kind: input, shape index: {}]   ;;  %s787_s3 = inlined_call_operand.hbm [shape: f32[256,256], index: 3, kind: input, shape index: {}]   ;;  %s788_s4 = inlined_call_operand.vmem [shape: f32[1,256], index: 4, kind: input, shape index: {}]   ;;  %s789_s5 = inlined_call_operand.hbm [shape: f32[8,256], index: 5, kind: output, shape index: {}]  }
   0x1   :  { %11 = vsyncpa [#allocation6], 0 }
   0x2   :  { %12 = vsyncpa [#allocation4], 0  ;;  %s685_s18 = smov [#allocation5]   ;;  %s591_s22 = scalar_lea.hbm %s785_s1, 8192 }
   0x3   :  { %s28_s19 = sshll.u32 %s685_s18, 4  ;;  %p592_p0 = scmp.ne.s32.totalorder %s785_s1, %s591_s22  ;;  %s29_s19 = int_to_ptr.vmem [resolvable:$true] %s28_s19 }
   0x4   :  { %p595_p1 = scmp.lt.u32.totalorder %s591_s22, %s785_s1 }
   0x6   :  { %p597_p2 = pnand %p595_p1, %p592_p0 }
   0x8   :  { %600 = shalt.err (!%p597_p2)
}
   0x9   :  { %s601_s27 = scalar_lea.vmem %s29_s19, 8192  ;;  %p606_p4 = scmp.lt.s32.totalorder %s29_s19, %s29_s19 }
   0xa   :  { %p602_p3 = scmp.ne.s32.totalorder %s29_s19, %s601_s27  ;;  %p607_p5 = scmp.lt.s32.totalorder %s601_s27, %s601_s27 }
   0xc   :  { %p608_p6 = por %p607_p5, %p606_p4 }
   0xe   :  { %p609_p7 = pnand %p608_p6, %p602_p3 }
  0x10   :  { %612 = shalt.err (!%p609_p7)
}
  0x11   :  { %s686_s28 = smov 512   ;;  %s687_s29 = smov 32  }
  0x12   :  { %34 = dma.hbm_to_vmem [thread:$0]  %s785_s1, 8192, %s29_s19, [#allocation6], %s686_s28, %s686_s28, %s687_s29  }
  0x13   :  { %s688_s7 = smov [#allocation2]   ;;  %s689_s9 = smov [#allocation7]  }
  0x14   :  { %s19_s8 = sshll.u32 %s688_s7, 4  ;;  %s42_s10 = sshll.u32 %s689_s9, 4  ;;  %s20_s8 = int_to_ptr.vmem [resolvable:$true] %s19_s8  ;;  %s43_s10 = int_to_ptr.vmem [resolvable:$true] %s42_s10 }
  0x15   :  { %s613_s13 = scalar_lea.hbm %s784_s0, 128 }
  0x16   :  { %p614_p8 = scmp.ne.s32.totalorder %s784_s0, %s613_s13  ;;  %p617_p9 = scmp.lt.u32.totalorder %s613_s13, %s784_s0 }
  0x18   :  { %p619_p10 = pnand %p617_p9, %p614_p8 }
  0x1a   :  { %622 = shalt.err (!%p619_p10)
}
  0x1b   :  { %s623_s1 = scalar_lea.vmem %s20_s8, 128  ;;  %p628_p12 = scmp.lt.s32.totalorder %s20_s8, %s20_s8 }
  0x1c   :  { %p624_p11 = scmp.ne.s32.totalorder %s20_s8, %s623_s1  ;;  %p629_p13 = scmp.lt.s32.totalorder %s623_s1, %s623_s1 }
  0x1e   :  { %p630_p0 = por %p629_p13, %p628_p12 }
  0x20   :  { %p631_p1 = pnand %p630_p0, %p624_p11 }
  0x22   :  { %634 = shalt.err (!%p631_p1)
}
  0x23   :  { %22 = dma.hbm_to_vmem [thread:$0]  %s784_s0, 128, %s20_s8, [#allocation3]  }
  0x24   :  { %s635_s22 = scalar_lea.hbm %s787_s3, 8192 }
  0x25   :  { %p636_p2 = scmp.ne.s32.totalorder %s787_s3, %s635_s22  ;;  %p639_p3 = scmp.lt.u32.totalorder %s635_s22, %s787_s3 }
  0x27   :  { %p641_p4 = pnand %p639_p3, %p636_p2 }
  0x29   :  { %644 = shalt.err (!%p641_p4)
}
  0x2a   :  { %s645_s27 = scalar_lea.vmem %s43_s10, 8192  ;;  %p650_p6 = scmp.lt.s32.totalorder %s43_s10, %s43_s10 }
  0x2b   :  { %p646_p5 = scmp.ne.s32.totalorder %s43_s10, %s645_s27  ;;  %p651_p7 = scmp.lt.s32.totalorder %s645_s27, %s645_s27 }
  0x2d   :  { %p652_p8 = por %p651_p7, %p650_p6 }
  0x2f   :  { %p653_p9 = pnand %p652_p8, %p646_p5 }
  0x31   :  { %656 = shalt.err (!%p653_p9)
}
  0x32   :  { %s690_s0 = smov 256   ;;  %s691_s28 = smov 16  }
  0x33   :  { %48 = dma.hbm_to_vmem [thread:$0]  %s787_s3, 8192, %s43_s10, [#allocation6], %s690_s0, %s690_s0, %s691_s28  }
  0x34   :  { %679 = dma.done.wait [#allocation3], 128  }
  0x35   :  { %680 = vsyncadd [#allocation3], 4294967168 }
  0x36   :  { %681 = dma.done.wait [#allocation6], 16384  }
  0x37   :  { %682 = vsyncadd [#allocation6], 4294950912  ;;  %v692_v0 = vmov 0.0   ;;  %v62_v1 = vld [vmem:[#allocation5 + $0x8] sm:$0xff]  ;;  %v61_v3 = vld [vmem:[#allocation5] sm:$0xff] }
  0x38   :  { %189 = vmatprep.mubr.f32.mxu1 %v692_v0  ;;  %v66_v2 = vld [vmem:[#allocation5 + $0x28] sm:$0xff]  ;;  %v65_v5 = vld [vmem:[#allocation5 + $0x20] sm:$0xff]  ;;  %v286_v45 = vld [vmem:[#allocation7 + $0x18] sm:$0xff] }
  0x39   :  { %v450_v4 = vpack.c.bf16 %v66_v2, %v62_v1  ;;  %v70_v6 = vld [vmem:[#allocation5 + $0x48] sm:$0xff]  ;;  %v452_v8 = vpack.c.bf16 %v65_v5, %v61_v3  ;;  %v69_v10 = vld [vmem:[#allocation5 + $0x40] sm:$0xff]  ;;  %v285_v47 = vld [vmem:[#allocation7 + $0x10] sm:$0xff] }
  0x3a   :  { %v74_v7 = vld [vmem:[#allocation5 + $0x68] sm:$0xff]  ;;  %v73_v11 = vld [vmem:[#allocation5 + $0x60] sm:$0xff]  ;;  %v290_v51 = vld [vmem:[#allocation7 + $0x38] sm:$0xff] }
  0x3b   :  { %v454_v9 = vpack.c.bf16 %v74_v7, %v70_v6  ;;  %v78_v12 = vld [vmem:[#allocation5 + $0x88] sm:$0xff]  ;;  %451 = vmatprep.subr.bf16.mxu1 %v450_v4  ;;  %v456_v14 = vpack.c.bf16 %v73_v11, %v69_v10  ;;  %v77_v16 = vld [vmem:[#allocation5 + $0x80] sm:$0xff]  ;;  %v289_v55 = vld [vmem:[#allocation7 + $0x30] sm:$0xff] }
  0x3c   :  { %v82_v13 = vld [vmem:[#allocation5 + $0xa8] sm:$0xff]  ;;  %453 = vmatpush1.bf16.msra.mxu1 %v452_v8  ;;  %v81_v17 = vld [vmem:[#allocation5 + $0xa0] sm:$0xff]  ;;  %v294_v57 = vld [vmem:[#allocation7 + $0x58] sm:$0xff] }
  0x3d   :  { %455 = vmatprep.subr.bf16.mxu1 %v454_v9  ;;  %v458_v15 = vpack.c.bf16 %v82_v13, %v78_v12  ;;  %v86_v18 = vld [vmem:[#allocation5 + $0xc8] sm:$0xff]  ;;  %v460_v20 = vpack.c.bf16 %v81_v17, %v77_v16  ;;  %v85_v22 = vld [vmem:[#allocation5 + $0xc0] sm:$0xff]  ;;  %v64_v61 = vld [vmem:[#allocation5 + $0x18] sm:$0xff] }
  0x3e   :  { %v90_v19 = vld [vmem:[#allocation5 + $0xe8] sm:$0xff]  ;;  %v89_v23 = vld [vmem:[#allocation5 + $0xe0] sm:$0xff]  ;;  %v68_v62 = vld [vmem:[#allocation5 + $0x38] sm:$0xff] }
  0x3f   :  { %v462_v21 = vpack.c.bf16 %v90_v19, %v86_v18  ;;  %v94_v24 = vld [vmem:[#allocation5 + $0x108] sm:$0xff]  ;;  %v464_v26 = vpack.c.bf16 %v89_v23, %v85_v22  ;;  %v93_v28 = vld [vmem:[#allocation5 + $0x100] sm:$0xff]  ;;  %v293_v3 = vld [vmem:[#allocation7 + $0x50] sm:$0xff]  ;;  %v482_v7 = vpack.c.bf16 %v68_v62, %v64_v61 }
  0x40   :  { %457 = vmatpush1.bf16.msra.mxu1 %v456_v14  ;;  %v98_v25 = vld [vmem:[#allocation5 + $0x128] sm:$0xff]  ;;  %v97_v29 = vld [vmem:[#allocation5 + $0x120] sm:$0xff]  ;;  %v298_v6 = vld [vmem:[#allocation7 + $0x78] sm:$0xff] }
  0x41   :  { %459 = vmatprep.subr.bf16.mxu1 %v458_v15  ;;  %v466_v27 = vpack.c.bf16 %v98_v25, %v94_v24  ;;  %v102_v30 = vld [vmem:[#allocation5 + $0x148] sm:$0xff]  ;;  %v468_v32 = vpack.c.bf16 %v97_v29, %v93_v28  ;;  %v101_v34 = vld [vmem:[#allocation5 + $0x140] sm:$0xff]  ;;  %v63_v8 = vld [vmem:[#allocation5 + $0x10] sm:$0xff] }
  0x42   :  { %v106_v31 = vld [vmem:[#allocation5 + $0x168] sm:$0xff]  ;;  %v105_v35 = vld [vmem:[#allocation5 + $0x160] sm:$0xff]  ;;  %v67_v9 = vld [vmem:[#allocation5 + $0x30] sm:$0xff] }
  0x43   :  { %v470_v33 = vpack.c.bf16 %v106_v31, %v102_v30  ;;  %v110_v36 = vld [vmem:[#allocation5 + $0x188] sm:$0xff]  ;;  %v472_v38 = vpack.c.bf16 %v105_v35, %v101_v34  ;;  %v109_v39 = vld [vmem:[#allocation5 + $0x180] sm:$0xff]  ;;  %v72_v10 = vld [vmem:[#allocation5 + $0x58] sm:$0xff]  ;;  %v484_v17 = vpack.c.bf16 %v67_v9, %v63_v8 }
  0x44   :  { %461 = vmatpush1.bf16.msra.mxu1 %v460_v20  ;;  %v114_v37 = vld [vmem:[#allocation5 + $0x1a8] sm:$0xff]  ;;  %v113_v40 = vld [vmem:[#allocation5 + $0x1a0] sm:$0xff]  ;;  %v76_v11 = vld [vmem:[#allocation5 + $0x78] sm:$0xff] }
  0x45   :  { %463 = vmatprep.subr.bf16.mxu1 %v462_v21  ;;  %v474_v41 = vpack.c.bf16 %v114_v37, %v110_v36  ;;  %v118_v42 = vld [vmem:[#allocation5 + $0x1c8] sm:$0xff]  ;;  %v283_v46 = vld [vmem:[#allocation7] sm:$0xff]  ;;  %v476_v53 = vpack.c.bf16 %v113_v40, %v109_v39  ;;  %v297_v15 = vld [vmem:[#allocation7 + $0x70] sm:$0xff]  ;;  %v486_v20 = vpack.c.bf16 %v76_v11, %v72_v10 }
  0x46   :  { %v122_v43 = vld [vmem:[#allocation5 + $0x1e8] sm:$0xff]  ;;  %v516_v49 = vpack.c.bf16 %v285_v47, %v283_v46  ;;  %v287_v52 = vld [vmem:[#allocation7 + $0x20] sm:$0xff]  ;;  %v761_v16 = vld [vmem:[#allocation2] sm:$0xff] }
  0x47   :  { %v284_v44 = vld [vmem:[#allocation7 + $0x8] sm:$0xff]  ;;  %v478_v58 = vpack.c.bf16 %v122_v43, %v118_v42  ;;  %v117_v59 = vld [vmem:[#allocation5 + $0x1c0] sm:$0xff]  ;;  %v520_v63 = vpack.c.bf16 %v289_v55, %v287_v52  ;;  %v302_v19 = vld [vmem:[#allocation7 + $0x98] sm:$0xff] }
  0x48   :  { %465 = vmatpush1.bf16.msra.mxu1 %v464_v26  ;;  %v514_v48 = vpack.c.bf16 %v286_v45, %v284_v44  ;;  %v288_v50 = vld [vmem:[#allocation7 + $0x28] sm:$0xff]  ;;  %v121_v60 = vld [vmem:[#allocation5 + $0x1e0] sm:$0xff]  ;;  %v71_v21 = vld [vmem:[#allocation5 + $0x50] sm:$0xff] }
  0x49   :  { %467 = vmatprep.subr.bf16.mxu1 %v466_v27  ;;  %v518_v54 = vpack.c.bf16 %v290_v51, %v288_v50  ;;  %v292_v56 = vld [vmem:[#allocation7 + $0x48] sm:$0xff]  ;;  %v291_v2 = vld [vmem:[#allocation7 + $0x40] sm:$0xff]  ;;  %v480_v4 = vpack.c.bf16 %v121_v60, %v117_v59  ;;  %v75_v22 = vld [vmem:[#allocation5 + $0x70] sm:$0xff] }
  0x4a   :  { %515 = vmatprep.subr.bf16.mxu0 %v514_v48  ;;  %v522_v1 = vpack.c.bf16 %v294_v57, %v292_v56  ;;  %v296_v5 = vld [vmem:[#allocation7 + $0x68] sm:$0xff]  ;;  %v524_v12 = vpack.c.bf16 %v293_v3, %v291_v2  ;;  %v295_v14 = vld [vmem:[#allocation7 + $0x60] sm:$0xff]  ;;  %v80_v23 = vld [vmem:[#allocation5 + $0x98] sm:$0xff]  ;;  %v488_v29 = vpack.c.bf16 %v75_v22, %v71_v21 }
  0x4b   :  { %517 = vmatpush1.bf16.msra.mxu0 %v516_v49  ;;  %v526_v13 = vpack.c.bf16 %v298_v6, %v296_v5  ;;  %v300_v18 = vld [vmem:[#allocation7 + $0x88] sm:$0xff]  ;;  %v84_v24 = vld [vmem:[#allocation5 + $0xb8] sm:$0xff]  ;;  %v528_v25 = vpack.c.bf16 %v297_v15, %v295_v14  ;;  %v299_v27 = vld [vmem:[#allocation7 + $0x80] sm:$0xff] }
  0x4c   :  { %469 = vmatpush1.bf16.msra.mxu1 %v468_v32  ;;  %519 = vmatprep.subr.bf16.mxu0 %v518_v54  ;;  %v530_v26 = vpack.c.bf16 %v302_v19, %v300_v18  ;;  %v301_v28 = vld [vmem:[#allocation7 + $0x90] sm:$0xff]  ;;  %v304_v30 = vld [vmem:[#allocation7 + $0xa8] sm:$0xff]  ;;  %v306_v31 = vld [vmem:[#allocation7 + $0xb8] sm:$0xff]  ;;  %v490_v32 = vpack.c.bf16 %v84_v24, %v80_v23 }
  0x4d   :  { %471 = vmatprep.subr.bf16.mxu1 %v470_v33  ;;  %v79_v33 = vld [vmem:[#allocation5 + $0x90] sm:$0xff]  ;;  %v88_v35 = vld [vmem:[#allocation5 + $0xd8] sm:$0xff]  ;;  %v532_v37 = vpack.c.bf16 %v301_v28, %v299_v27  ;;  %v303_v39 = vld [vmem:[#allocation7 + $0xa0] sm:$0xff] }
  0x4e   :  { %v83_v34 = vld [vmem:[#allocation5 + $0xb0] sm:$0xff]  ;;  %v92_v36 = vld [vmem:[#allocation5 + $0xf8] sm:$0xff]  ;;  %v308_v42 = vld [vmem:[#allocation7 + $0xc8] sm:$0xff] }
  0x4f   :  { %521 = vmatpush1.bf16.msra.mxu0 %v520_v63  ;;  %v305_v40 = vld [vmem:[#allocation7 + $0xb0] sm:$0xff]  ;;  %v310_v43 = vld [vmem:[#allocation7 + $0xd8] sm:$0xff]  ;;  %v307_v10 = vld [vmem:[#allocation7 + $0xc0] sm:$0xff] }
  0x50   :  { %473 = vmatpush1.bf16.msra.mxu1 %v472_v38  ;;  %523 = vmatprep.subr.bf16.mxu0 %v522_v1  ;;  %v534_v38 = vpack.c.bf16 %v306_v31, %v304_v30  ;;  %v87_v44 = vld [vmem:[#allocation5 + $0xd0] sm:$0xff]  ;;  %v96_v46 = vld [vmem:[#allocation5 + $0x118] sm:$0xff]  ;;  %v536_v48 = vpack.c.bf16 %v305_v40, %v303_v39  ;;  %v538_v49 = vpack.c.bf16 %v310_v43, %v308_v42  ;;  %v315_v22 = vld [vmem:[#allocation7 + $0x100] sm:$0xff] }
  0x51   :  { %475 = vmatprep.subr.bf16.mxu1 %v474_v41  ;;  %v492_v41 = vpack.c.bf16 %v83_v34, %v79_v33  ;;  %v91_v45 = vld [vmem:[#allocation5 + $0xf0] sm:$0xff]  ;;  %v100_v47 = vld [vmem:[#allocation5 + $0x138] sm:$0xff]  ;;  %v319_v28 = vld [vmem:[#allocation7 + $0x120] sm:$0xff] }
  0x52   :  { %v496_v50 = vpack.c.bf16 %v91_v45, %v87_v44  ;;  %v498_v51 = vpack.c.bf16 %v100_v47, %v96_v46  ;;  %v95_v52 = vld [vmem:[#allocation5 + $0x110] sm:$0xff]  ;;  %v104_v54 = vld [vmem:[#allocation5 + $0x158] sm:$0xff]  ;;  %v324_v30 = vld [vmem:[#allocation7 + $0x148] sm:$0xff] }
  0x53   :  { %525 = vmatpush1.bf16.msra.mxu0 %v524_v12  ;;  %v108_v55 = vld [vmem:[#allocation5 + $0x178] sm:$0xff]  ;;  %v107_v59 = vld [vmem:[#allocation5 + $0x170] sm:$0xff]  ;;  %v323_v34 = vld [vmem:[#allocation7 + $0x140] sm:$0xff] }
  0x54   :  { %477 = vmatpush1.bf16.msra.mxu1 %v476_v53  ;;  %527 = vmatprep.subr.bf16.mxu0 %v526_v13  ;;  %v99_v53 = vld [vmem:[#allocation5 + $0x130] sm:$0xff]  ;;  %v502_v57 = vpack.c.bf16 %v108_v55, %v104_v54  ;;  %v112_v60 = vld [vmem:[#allocation5 + $0x198] sm:$0xff]  ;;  %v312_v13 = vld [vmem:[#allocation7 + $0xe8] sm:$0xff] }
  0x55   :  { %479 = vmatprep.subr.bf16.mxu1 %v478_v58  ;;  %v500_v56 = vpack.c.bf16 %v99_v53, %v95_v52  ;;  %v103_v58 = vld [vmem:[#allocation5 + $0x150] sm:$0xff]  ;;  %v116_v61 = vld [vmem:[#allocation5 + $0x1b8] sm:$0xff]  ;;  %v327_v40 = vld [vmem:[#allocation7 + $0x160] sm:$0xff] }
  0x56   :  { %v504_v62 = vpack.c.bf16 %v107_v59, %v103_v58  ;;  %v506_v63 = vpack.c.bf16 %v116_v61, %v112_v60  ;;  %v111_v1 = vld [vmem:[#allocation5 + $0x190] sm:$0xff]  ;;  %v120_v3 = vld [vmem:[#allocation5 + $0x1d8] sm:$0xff]  ;;  %v332_v42 = vld [vmem:[#allocation7 + $0x188] sm:$0xff] }
  0x57   :  { %529 = vmatpush1.bf16.msra.mxu0 %v528_v25  ;;  %v115_v2 = vld [vmem:[#allocation5 + $0x1b0] sm:$0xff]  ;;  %v314_v14 = vld [vmem:[#allocation7 + $0xf8] sm:$0xff]  ;;  %v320_v25 = vld [vmem:[#allocation7 + $0x128] sm:$0xff] }
  0x58   :  { %481 = vmatpush1.bf16.msra.mxu1 %v480_v4  ;;  %531 = vmatprep.subr.bf16.mxu0 %v530_v26  ;;  %v124_v4 = vld [vmem:[#allocation5 + $0x1f8] sm:$0xff]  ;;  %v508_v5 = vpack.c.bf16 %v115_v2, %v111_v1  ;;  %v123_v8 = vld [vmem:[#allocation5 + $0x1f0] sm:$0xff]  ;;  %v542_v15 = vpack.c.bf16 %v314_v14, %v312_v13  ;;  %v331_v45 = vld [vmem:[#allocation7 + $0x180] sm:$0xff] }
  0x59   :  { %483 = vmatprep.subr.bf16.mxu1 %v482_v7  ;;  %v510_v6 = vpack.c.bf16 %v124_v4, %v120_v3  ;;  %v119_v7 = vld [vmem:[#allocation5 + $0x1d0] sm:$0xff]  ;;  %v318_v21 = vld [vmem:[#allocation7 + $0x118] sm:$0xff]  ;;  %v336_v47 = vld [vmem:[#allocation7 + $0x1a8] sm:$0xff]  ;;  %v269_v3 = vlaneseq }
  0x5a   :  { %v512_v9 = vpack.c.bf16 %v123_v8, %v119_v7  ;;  %v309_v11 = vld [vmem:[#allocation7 + $0xd0] sm:$0xff]  ;;  %v322_v26 = vld [vmem:[#allocation7 + $0x138] sm:$0xff]  ;;  %v340_v53 = vld [vmem:[#allocation7 + $0x1c8] sm:$0xff] }
  0x5b   :  { %190 = vmatmul.mubr.f32.vlgmr.msra.gmra.mrb[0].mxu1 %v761_v16  ;;  %533 = vmatpush1.bf16.msra.mxu0 %v532_v37  ;;  %v540_v12 = vpack.c.bf16 %v309_v11, %v307_v10  ;;  %v313_v18 = vld [vmem:[#allocation7 + $0xf0] sm:$0xff]  ;;  %v550_v27 = vpack.c.bf16 %v322_v26, %v320_v25  ;;  %v326_v31 = vld [vmem:[#allocation7 + $0x158] sm:$0xff]  ;;  %v344_v60 = vld [vmem:[#allocation7 + $0x1e8] sm:$0xff]  ;;  %v270_v4 = vshrl.u32 %v269_v3, 7 }
  0x5c   :  { %485 = vmatpush1.bf16.msra.mxu1 %v484_v17  ;;  %260 = vmatprep.mubr.f32.mxu1 %v692_v0  ;;  %v494_v0 = vpack.c.bf16 %v92_v36, %v88_v35  ;;  %v311_v17 = vld [vmem:[#allocation7 + $0xe0] sm:$0xff]  ;;  %v317_v24 = vld [vmem:[#allocation7 + $0x110] sm:$0xff]  ;;  %v554_v33 = vpack.c.bf16 %v326_v31, %v324_v30  ;;  %v328_v36 = vld [vmem:[#allocation7 + $0x168] sm:$0xff] }
  0x5d   :  { %487 = vmatprep.subr.bf16.mxu1 %v486_v20  ;;  %535 = vmatprep.subr.bf16.mxu0 %v534_v38  ;;  %v544_v19 = vpack.c.bf16 %v313_v18, %v311_v17  ;;  %v316_v20 = vld [vmem:[#allocation7 + $0x108] sm:$0xff]  ;;  %v325_v35 = vld [vmem:[#allocation7 + $0x150] sm:$0xff]  ;;  %v330_v37 = vld [vmem:[#allocation7 + $0x178] sm:$0xff]  ;;  %v275_v7 = vsub.s32 1, %v270_v4 }
  0x5e   :  { %v546_v23 = vpack.c.bf16 %v318_v21, %v316_v20  ;;  %v556_v38 = vpack.c.bf16 %v325_v35, %v323_v34  ;;  %v558_v39 = vpack.c.bf16 %v330_v37, %v328_v36  ;;  %v334_v43 = vld [vmem:[#allocation7 + $0x198] sm:$0xff]  ;;  %v333_v46 = vld [vmem:[#allocation7 + $0x190] sm:$0xff] }
  0x5f   :  { %537 = vmatpush1.bf16.msra.mxu0 %v536_v48  ;;  %v562_v44 = vpack.c.bf16 %v334_v43, %v332_v42  ;;  %v338_v48 = vld [vmem:[#allocation7 + $0x1b8] sm:$0xff]  ;;  %v337_v52 = vld [vmem:[#allocation7 + $0x1b0] sm:$0xff] }
  0x60   :  { %489 = vmatpush1.bf16.msra.mxu1 %v488_v29  ;;  %539 = vmatprep.subr.bf16.mxu0 %v538_v49  ;;  %v321_v29 = vld [vmem:[#allocation7 + $0x130] sm:$0xff]  ;;  %v564_v49 = vpack.c.bf16 %v333_v46, %v331_v45  ;;  %v342_v54 = vld [vmem:[#allocation7 + $0x1d8] sm:$0xff] }
  0x61   :  { %491 = vmatprep.subr.bf16.mxu1 %v490_v32  ;;  %v552_v32 = vpack.c.bf16 %v321_v29, %v319_v28  ;;  %v341_v58 = vld [vmem:[#allocation7 + $0x1d0] sm:$0xff]  ;;  %v346_v61 = vld [vmem:[#allocation7 + $0x1f8] sm:$0xff] }
  0x62   :  { %v345_v1 = vld [vmem:[#allocation7 + $0x1f0] sm:$0xff]  ;;  %v267_v14 = vld [vmem:[%s786_s2] sm:$0x3] }
  0x63   :  { %541 = vmatpush1.bf16.msra.mxu0 %v540_v12  ;;  %v276_v17 = vrot.slane %v267_v14, %v275_v7 }
  0x64   :  { %493 = vmatpush1.bf16.msra.mxu1 %v492_v41  ;;  %543 = vmatprep.subr.bf16.mxu0 %v542_v15  ;;  %v329_v41 = vld [vmem:[#allocation7 + $0x170] sm:$0xff] }
  0x65   :  { %495 = vmatprep.subr.bf16.mxu1 %v494_v0  ;;  %v560_v0 = vpack.c.bf16 %v329_v41, %v327_v40 }
  0x67   :  { %545 = vmatpush1.bf16.msra.mxu0 %v544_v19 }
  0x68   :  { %497 = vmatpush1.bf16.msra.mxu1 %v496_v50  ;;  %547 = vmatprep.subr.bf16.mxu0 %v546_v23  ;;  %v566_v50 = vpack.c.bf16 %v338_v48, %v336_v47 }
  0x69   :  { %499 = vmatprep.subr.bf16.mxu1 %v498_v51  ;;  %v335_v51 = vld [vmem:[#allocation7 + $0x1a0] sm:$0xff] }
  0x6a   :  { %v568_v55 = vpack.c.bf16 %v337_v52, %v335_v51 }
  0x6c   :  { %501 = vmatpush1.bf16.msra.mxu1 %v500_v56  ;;  %v570_v56 = vpack.c.bf16 %v342_v54, %v340_v53 }
  0x6d   :  { %503 = vmatprep.subr.bf16.mxu1 %v502_v57  ;;  %v339_v57 = vld [vmem:[#allocation7 + $0x1c0] sm:$0xff] }
  0x6e   :  { %v572_v59 = vpack.c.bf16 %v341_v58, %v339_v57 }
  0x70   :  { %505 = vmatpush1.bf16.msra.mxu1 %v504_v62  ;;  %v574_v62 = vpack.c.bf16 %v346_v61, %v344_v60 }
  0x71   :  { %507 = vmatprep.subr.bf16.mxu1 %v506_v63  ;;  %v343_v63 = vld [vmem:[#allocation7 + $0x1e0] sm:$0xff] }
  0x72   :  { %v576_v2 = vpack.c.bf16 %v345_v1, %v343_v63 }
  0x74   :  { %509 = vmatpush1.bf16.msra.mxu1 %v508_v5  ;;  %v271_v5 = vsub.s32 0, %v270_v4 }
  0x75   :  { %511 = vmatprep.subr.bf16.mxu1 %v510_v6  ;;  %v347_v6 = vld [vmem:[%s788_s4] sm:$0x3]  ;;  %s693_s4 = smov [#allocation8]  }
  0x76   :  { %v352_v8 = vrot.slane %v347_v6, %v271_v5  ;;  %v272_v15 = vrot.slane %v267_v14, %v271_v5  ;;  %s440_s9 = sshll.u32 %s693_s4, 4  ;;  %s441_s9 = int_to_ptr.vmem [resolvable:$true] %s440_s9 }
  0x77   :  { %s657_s2 = scalar_lea.vmem %s441_s9, 256  ;;  %p662_p11 = scmp.lt.s32.totalorder %s441_s9, %s441_s9 }
  0x78   :  { %513 = vmatpush1.bf16.msra.mxu1 %v512_v9  ;;  %v356_v9 = vrot.slane %v347_v6, %v275_v7  ;;  %p658_p10 = scmp.ne.s32.totalorder %s441_s9, %s657_s2  ;;  %p663_p12 = scmp.lt.s32.totalorder %s657_s2, %s657_s2 }
  0x7a   :  { %p664_p13 = por %p663_p12, %p662_p11 }
  0x7b   :  { %261 = vmatmul.mubr.f32.vlgmr.msra.gmra.mrb[2].mxu1 %v761_v16  ;;  %v548_v16 = vpack.c.bf16 %v317_v24, %v315_v22 }
  0x7c   :  { %p665_p0 = pnand %p664_p13, %p658_p10 }
  0x7d   :  { %549 = vmatpush1.bf16.msra.mxu0 %v548_v16 }
  0x7e   :  { %551 = vmatprep.subr.bf16.mxu0 %v550_v27 }
  0x81   :  { %553 = vmatpush1.bf16.msra.mxu0 %v552_v32 }
  0x82   :  { %555 = vmatprep.subr.bf16.mxu0 %v554_v33 }
  0x85   :  { %557 = vmatpush1.bf16.msra.mxu0 %v556_v38 }
  0x86   :  { %559 = vmatprep.subr.bf16.mxu0 %v558_v39 }
  0x89   :  { %561 = vmatpush1.bf16.msra.mxu0 %v560_v0 }
  0x8a   :  { %563 = vmatprep.subr.bf16.mxu0 %v562_v44 }
  0x8d   :  { %565 = vmatpush1.bf16.msra.mxu0 %v564_v49 }
  0x8e   :  { %567 = vmatprep.subr.bf16.mxu0 %v566_v50 }
  0x91   :  { %569 = vmatpush1.bf16.msra.mxu0 %v568_v55 }
  0x92   :  { %571 = vmatprep.subr.bf16.mxu0 %v570_v56 }
  0x95   :  { %573 = vmatpush1.bf16.msra.mxu0 %v572_v59 }
  0x96   :  { %575 = vmatprep.subr.bf16.mxu0 %v574_v62 }
  0x99   :  { %577 = vmatpush1.bf16.msra.mxu0 %v576_v2 }
 0x12e   :  { %v191_v10 = vpop.f32.mrb[0].mxu1 }
 0x12f   :  { %v578_v11 = vadd.f32 %v352_v8, %v191_v10  ;;  %v193_v12 = vpop.f32.mrb[1].mxu1 }
 0x130   :  { %v580_v13 = vadd.f32 %v356_v9, %v193_v12 }
 0x14e   :  { %v262_v18 = vpop.f32.mrb[2].mxu1 }
 0x14f   :  { %v279_v19 = vadd.f32 %v272_v15, %v262_v18  ;;  %v264_v20 = vpop.f32.mrb[3].mxu1 }
 0x150   :  { %v280_v21 = vadd.f32 %v276_v17, %v264_v20 }
 0x151   :  { %v281_v23 = vmax.f32 %v279_v19, 0.0 }
 0x152   :  { %v282_v22 = vmax.f32 %v280_v21, 0.0 }
 0x154   :  { %423 = vmatprep.mubr.f32.mxu0 %v282_v22 }
 0x155   :  { %424 = vmatmul.mubr.f32.vlgmr.msra.gmra.mrb[0].mxu0 %v281_v23 }
 0x228   :  { %v425_v24 = vpop.f32.mrb[0].mxu0 }
 0x229   :  { %v579_v25 = vadd.f32 %v578_v11, %v425_v24  ;;  %v427_v26 = vpop.f32.mrb[1].mxu0 }
 0x22a   :  { %v581_v16 = vadd.f32 %v580_v13, %v427_v26 }
 0x22b   :  { %432 = vst [vmem:[#allocation8] sm:$0xff] %v579_v25 }
 0x22c   :  { %433 = vst [vmem:[#allocation8 + $0x8] sm:$0xff] %v581_v16 }
 0x22d   :  { %668 = shalt.err (!%p665_p0)
}
 0x22e   :  { %s669_s12 = scalar_lea.hbm %s789_s5, 256 }
 0x22f   :  { %p670_p1 = scmp.ne.s32.totalorder %s789_s5, %s669_s12  ;;  %p673_p2 = scmp.lt.u32.totalorder %s669_s12, %s789_s5 }
 0x231   :  { %p675_p3 = pnand %p673_p2, %p670_p1 }
 0x233   :  { %678 = shalt.err (!%p675_p3)
}
 0x234   :  { %443 = dma.vmem_to_hbm [thread:$0]  %s441_s9, 256, %s789_s5, [#allocation4]  }
 0x235   :  { %683 = dma.done.wait [#allocation4], 256  }
 0x236   :  { %684 = vsyncadd [#allocation4], 4294967040 }
 0x237   :  { %447 = vsyncpa [#allocation3], 1 }
 0x238   :  { %448 = vsyncpa [#allocation6], 1 }
 0x239   :  { %449 = vsyncpa [#allocation4], 1 }

// kernel: tpu_custom_call.1
= control target key start
LH: loop header
LB: loop body
LE: loop exit
PB: predicated region body
PF: predicated region fallthrough
CT: control target
= control target key end

     0   :  { %10 = vsyncpa [#allocation3], 0  ;;  %s784_s0 = inlined_call_operand.hbm [shape: f32[8,128], index: 0, kind: input, shape index: {}]   ;;  %s785_s1 = inlined_call_operand.hbm [shape: f32[128,512], index: 1, kind: input, shape index: {}]   ;;  %s786_s2 = inlined_call_operand.vmem [shape: f32[1,256], index: 2, kind: input, shape index: {}]   ;;  %s787_s3 = inlined_call_operand.hbm [shape: f32[256,256], index: 3, kind: input, shape index: {}]   ;;  %s788_s4 = inlined_call_operand.vmem [shape: f32[1,256], index: 4, kind: input, shape index: {}]   ;;  %s789_s5 = inlined_call_operand.hbm [shape: f32[8,256], index: 5, kind: output, shape index: {}]  }
   0x1   :  { %11 = vsyncpa [#allocation6], 0 }
   0x2   :  { %12 = vsyncpa [#allocation4], 0  ;;  %s685_s18 = smov [#allocation5]   ;;  %s591_s22 = scalar_lea.hbm %s785_s1, 8192 }
   0x3   :  { %s28_s19 = sshll.u32 %s685_s18, 4  ;;  %p592_p0 = scmp.ne.s32.totalorder %s785_s1, %s591_s22  ;;  %s29_s19 = int_to_ptr.vmem [resolvable:$true] %s28_s19 }
   0x4   :  { %p595_p1 = scmp.lt.u32.totalorder %s591_s22, %s785_s1 }
   0x6   :  { %p597_p2 = pnand %p595_p1, %p592_p0 }
   0x8   :  { %600 = shalt.err (!%p597_p2)
}
   0x9   :  { %s601_s27 = scalar_lea.vmem %s29_s19, 8192  ;;  %p606_p4 = scmp.lt.s32.totalorder %s29_s19, %s29_s19 }
   0xa   :  { %p602_p3 = scmp.ne.s32.totalorder %s29_s19, %s601_s27  ;;  %p607_p5 = scmp.lt.s32.totalorder %s601_s27, %s601_s27 }
   0xc   :  { %p608_p6 = por %p607_p5, %p606_p4 }
   0xe   :  { %p609_p7 = pnand %p608_p6, %p602_p3 }
  0x10   :  { %612 = shalt.err (!%p609_p7)
}
  0x11   :  { %s686_s28 = smov 512   ;;  %s687_s29 = smov 32  }
  0x12   :  { %34 = dma.hbm_to_vmem [thread:$0]  %s785_s1, 8192, %s29_s19, [#allocation6], %s686_s28, %s686_s28, %s687_s29  }
  0x13   :  { %s688_s7 = smov [#allocation2]   ;;  %s689_s9 = smov [#allocation7]  }
  0x14   :  { %s19_s8 = sshll.u32 %s688_s7, 4  ;;  %s42_s10 = sshll.u32 %s689_s9, 4  ;;  %s20_s8 = int_to_ptr.vmem [resolvable:$true] %s19_s8  ;;  %s43_s10 = int_to_ptr.vmem [resolvable:$true] %s42_s10 }
  0x15   :  { %s613_s13 = scalar_lea.hbm %s784_s0, 128 }
  0x16   :  { %p614_p8 = scmp.ne.s32.totalorder %s784_s0, %s613_s13  ;;  %p617_p9 = scmp.lt.u32.totalorder %s613_s13, %s784_s0 }
  0x18   :  { %p619_p10 = pnand %p617_p9, %p614_p8 }
  0x1a   :  { %622 = shalt.err (!%p619_p10)
}
  0x1b   :  { %s623_s1 = scalar_lea.vmem %s20_s8, 128  ;;  %p628_p12 = scmp.lt.s32.totalorder %s20_s8, %s20_s8 }
  0x1c   :  { %p624_p11 = scmp.ne.s32.totalorder %s20_s8, %s623_s1  ;;  %p629_p13 = scmp.lt.s32.totalorder %s623_s1, %s623_s1 }
  0x1e   :  { %p630_p0 = por %p629_p13, %p628_p12 }
  0x20   :  { %p631_p1 = pnand %p630_p0, %p624_p11 }
  0x22   :  { %634 = shalt.err (!%p631_p1)
}
  0x23   :  { %22 = dma.hbm_to_vmem [thread:$0]  %s784_s0, 128, %s20_s8, [#allocation3]  }
  0x24   :  { %s635_s22 = scalar_lea.hbm %s787_s3, 8192 }
  0x25   :  { %p636_p2 = scmp.ne.s32.totalorder %s787_s3, %s635_s22  ;;  %p639_p3 = scmp.lt.u32.totalorder %s635_s22, %s787_s3 }
  0x27   :  { %p641_p4 = pnand %p639_p3, %p636_p2 }
  0x29   :  { %644 = shalt.err (!%p641_p4)
}
  0x2a   :  { %s645_s27 = scalar_lea.vmem %s43_s10, 8192  ;;  %p650_p6 = scmp.lt.s32.totalorder %s43_s10, %s43_s10 }
  0x2b   :  { %p646_p5 = scmp.ne.s32.totalorder %s43_s10, %s645_s27  ;;  %p651_p7 = scmp.lt.s32.totalorder %s645_s27, %s645_s27 }
  0x2d   :  { %p652_p8 = por %p651_p7, %p650_p6 }
  0x2f   :  { %p653_p9 = pnand %p652_p8, %p646_p5 }
  0x31   :  { %656 = shalt.err (!%p653_p9)
}
  0x32   :  { %s690_s0 = smov 256   ;;  %s691_s28 = smov 16  }
  0x33   :  { %48 = dma.hbm_to_vmem [thread:$0]  %s787_s3, 8192, %s43_s10, [#allocation6], %s690_s0, %s690_s0, %s691_s28  }
  0x34   :  { %679 = dma.done.wait [#allocation3], 128  }
  0x35   :  { %680 = vsyncadd [#allocation3], 4294967168 }
  0x36   :  { %681 = dma.done.wait [#allocation6], 16384  }
  0x37   :  { %682 = vsyncadd [#allocation6], 4294950912  ;;  %v692_v0 = vmov 0.0   ;;  %v62_v1 = vld [vmem:[#allocation5 + $0x8] sm:$0xff]  ;;  %v61_v3 = vld [vmem:[#allocation5] sm:$0xff] }
  0x38   :  { %189 = vmatprep.mubr.f32.mxu1 %v692_v0  ;;  %v66_v2 = vld [vmem:[#allocation5 + $0x28] sm:$0xff]  ;;  %v65_v5 = vld [vmem:[#allocation5 + $0x20] sm:$0xff]  ;;  %v286_v45 = vld [vmem:[#allocation7 + $0x18] sm:$0xff] }
  0x39   :  { %v450_v4 = vpack.c.bf16 %v66_v2, %v62_v1  ;;  %v70_v6 = vld [vmem:[#allocation5 + $0x48] sm:$0xff]  ;;  %v452_v8 = vpack.c.bf16 %v65_v5, %v61_v3  ;;  %v69_v10 = vld [vmem:[#allocation5 + $0x40] sm:$0xff]  ;;  %v285_v47 = vld [vmem:[#allocation7 + $0x10] sm:$0xff] }
  0x3a   :  { %v74_v7 = vld [vmem:[#allocation5 + $0x68] sm:$0xff]  ;;  %v73_v11 = vld [vmem:[#allocation5 + $0x60] sm:$0xff]  ;;  %v290_v51 = vld [vmem:[#allocation7 + $0x38] sm:$0xff] }
  0x3b   :  { %v454_v9 = vpack.c.bf16 %v74_v7, %v70_v6  ;;  %v78_v12 = vld [vmem:[#allocation5 + $0x88] sm:$0xff]  ;;  %451 = vmatprep.subr.bf16.mxu1 %v450_v4  ;;  %v456_v14 = vpack.c.bf16 %v73_v11, %v69_v10  ;;  %v77_v16 = vld [vmem:[#allocation5 + $0x80] sm:$0xff]  ;;  %v289_v55 = vld [vmem:[#allocation7 + $0x30] sm:$0xff] }
  0x3c   :  { %v82_v13 = vld [vmem:[#allocation5 + $0xa8] sm:$0xff]  ;;  %453 = vmatpush1.bf16.msra.mxu1 %v452_v8  ;;  %v81_v17 = vld [vmem:[#allocation5 + $0xa0] sm:$0xff]  ;;  %v294_v57 = vld [vmem:[#allocation7 + $0x58] sm:$0xff] }
  0x3d   :  { %455 = vmatprep.subr.bf16.mxu1 %v454_v9  ;;  %v458_v15 = vpack.c.bf16 %v82_v13, %v78_v12  ;;  %v86_v18 = vld [vmem:[#allocation5 + $0xc8] sm:$0xff]  ;;  %v460_v20 = vpack.c.bf16 %v81_v17, %v77_v16  ;;  %v85_v22 = vld [vmem:[#allocation5 + $0xc0] sm:$0xff]  ;;  %v64_v61 = vld [vmem:[#allocation5 + $0x18] sm:$0xff] }
  0x3e   :  { %v90_v19 = vld [vmem:[#allocation5 + $0xe8] sm:$0xff]  ;;  %v89_v23 = vld [vmem:[#allocation5 + $0xe0] sm:$0xff]  ;;  %v68_v62 = vld [vmem:[#allocation5 + $0x38] sm:$0xff] }
  0x3f   :  { %v462_v21 = vpack.c.bf16 %v90_v19, %v86_v18  ;;  %v94_v24 = vld [vmem:[#allocation5 + $0x108] sm:$0xff]  ;;  %v464_v26 = vpack.c.bf16 %v89_v23, %v85_v22  ;;  %v93_v28 = vld [vmem:[#allocation5 + $0x100] sm:$0xff]  ;;  %v293_v3 = vld [vmem:[#allocation7 + $0x50] sm:$0xff]  ;;  %v482_v7 = vpack.c.bf16 %v68_v62, %v64_v61 }
  0x40   :  { %457 = vmatpush1.bf16.msra.mxu1 %v456_v14  ;;  %v98_v25 = vld [vmem:[#allocation5 + $0x128] sm:$0xff]  ;;  %v97_v29 = vld [vmem:[#allocation5 + $0x120] sm:$0xff]  ;;  %v298_v6 = vld [vmem:[#allocation7 + $0x78] sm:$0xff] }
  0x41   :  { %459 = vmatprep.subr.bf16.mxu1 %v458_v15  ;;  %v466_v27 = vpack.c.bf16 %v98_v25, %v94_v24  ;;  %v102_v30 = vld [vmem:[#allocation5 + $0x148] sm:$0xff]  ;;  %v468_v32 = vpack.c.bf16 %v97_v29, %v93_v28  ;;  %v101_v34 = vld [vmem:[#allocation5 + $0x140] sm:$0xff]  ;;  %v63_v8 = vld [vmem:[#allocation5 + $0x10] sm:$0xff] }
  0x42   :  { %v106_v31 = vld [vmem:[#allocation5 + $0x168] sm:$0xff]  ;;  %v105_v35 = vld [vmem:[#allocation5 + $0x160] sm:$0xff]  ;;  %v67_v9 = vld [vmem:[#allocation5 + $0x30] sm:$0xff] }
  0x43   :  { %v470_v33 = vpack.c.bf16 %v106_v31, %v102_v30  ;;  %v110_v36 = vld [vmem:[#allocation5 + $0x188] sm:$0xff]  ;;  %v472_v38 = vpack.c.bf16 %v105_v35, %v101_v34  ;;  %v109_v39 = vld [vmem:[#allocation5 + $0x180] sm:$0xff]  ;;  %v72_v10 = vld [vmem:[#allocation5 + $0x58] sm:$0xff]  ;;  %v484_v17 = vpack.c.bf16 %v67_v9, %v63_v8 }
  0x44   :  { %461 = vmatpush1.bf16.msra.mxu1 %v460_v20  ;;  %v114_v37 = vld [vmem:[#allocation5 + $0x1a8] sm:$0xff]  ;;  %v113_v40 = vld [vmem:[#allocation5 + $0x1a0] sm:$0xff]  ;;  %v76_v11 = vld [vmem:[#allocation5 + $0x78] sm:$0xff] }
  0x45   :  { %463 = vmatprep.subr.bf16.mxu1 %v462_v21  ;;  %v474_v41 = vpack.c.bf16 %v114_v37, %v110_v36  ;;  %v118_v42 = vld [vmem:[#allocation5 + $0x1c8] sm:$0xff]  ;;  %v283_v46 = vld [vmem:[#allocation7] sm:$0xff]  ;;  %v476_v53 = vpack.c.bf16 %v113_v40, %v109_v39  ;;  %v297_v15 = vld [vmem:[#allocation7 + $0x70] sm:$0xff]  ;;  %v486_v20 = vpack.c.bf16 %v76_v11, %v72_v10 }
  0x46   :  { %v122_v43 = vld [vmem:[#allocation5 + $0x1e8] sm:$0xff]  ;;  %v516_v49 = vpack.c.bf16 %v285_v47, %v283_v46  ;;  %v287_v52 = vld [vmem:[#allocation7 + $0x20] sm:$0xff]  ;;  %v761_v16 = vld [vmem:[#allocation2] sm:$0xff] }
  0x47   :  { %v284_v44 = vld [vmem:[#allocation7 + $0x8] sm:$0xff]  ;;  %v478_v58 = vpack.c.bf16 %v122_v43, %v118_v42  ;;  %v117_v59 = vld [vmem:[#allocation5 + $0x1c0] sm:$0xff]  ;;  %v520_v63 = vpack.c.bf16 %v289_v55, %v287_v52  ;;  %v302_v19 = vld [vmem:[#allocation7 + $0x98] sm:$0xff] }
  0x48   :  { %465 = vmatpush1.bf16.msra.mxu1 %v464_v26  ;;  %v514_v48 = vpack.c.bf16 %v286_v45, %v284_v44  ;;  %v288_v50 = vld [vmem:[#allocation7 + $0x28] sm:$0xff]  ;;  %v121_v60 = vld [vmem:[#allocation5 + $0x1e0] sm:$0xff]  ;;  %v71_v21 = vld [vmem:[#allocation5 + $0x50] sm:$0xff] }
  0x49   :  { %467 = vmatprep.subr.bf16.mxu1 %v466_v27  ;;  %v518_v54 = vpack.c.bf16 %v290_v51, %v288_v50  ;;  %v292_v56 = vld [vmem:[#allocation7 + $0x48] sm:$0xff]  ;;  %v291_v2 = vld [vmem:[#allocation7 + $0x40] sm:$0xff]  ;;  %v480_v4 = vpack.c.bf16 %v121_v60, %v117_v59  ;;  %v75_v22 = vld [vmem:[#allocation5 + $0x70] sm:$0xff] }
  0x4a   :  { %515 = vmatprep.subr.bf16.mxu0 %v514_v48  ;;  %v522_v1 = vpack.c.bf16 %v294_v57, %v292_v56  ;;  %v296_v5 = vld [vmem:[#allocation7 + $0x68] sm:$0xff]  ;;  %v524_v12 = vpack.c.bf16 %v293_v3, %v291_v2  ;;  %v295_v14 = vld [vmem:[#allocation7 + $0x60] sm:$0xff]  ;;  %v80_v23 = vld [vmem:[#allocation5 + $0x98] sm:$0xff]  ;;  %v488_v29 = vpack.c.bf16 %v75_v22, %v71_v21 }
  0x4b   :  { %517 = vmatpush1.bf16.msra.mxu0 %v516_v49  ;;  %v526_v13 = vpack.c.bf16 %v298_v6, %v296_v5  ;;  %v300_v18 = vld [vmem:[#allocation7 + $0x88] sm:$0xff]  ;;  %v84_v24 = vld [vmem:[#allocation5 + $0xb8] sm:$0xff]  ;;  %v528_v25 = vpack.c.bf16 %v297_v15, %v295_v14  ;;  %v299_v27 = vld [vmem:[#allocation7 + $0x80] sm:$0xff] }
  0x4c   :  { %469 = vmatpush1.bf16.msra.mxu1 %v468_v32  ;;  %519 = vmatprep.subr.bf16.mxu0 %v518_v54  ;;  %v530_v26 = vpack.c.bf16 %v302_v19, %v300_v18  ;;  %v301_v28 = vld [vmem:[#allocation7 + $0x90] sm:$0xff]  ;;  %v304_v30 = vld [vmem:[#allocation7 + $0xa8] sm:$0xff]  ;;  %v306_v31 = vld [vmem:[#allocation7 + $0xb8] sm:$0xff]  ;;  %v490_v32 = vpack.c.bf16 %v84_v24, %v80_v23 }
  0x4d   :  { %471 = vmatprep.subr.bf16.mxu1 %v470_v33  ;;  %v79_v33 = vld [vmem:[#allocation5 + $0x90] sm:$0xff]  ;;  %v88_v35 = vld [vmem:[#allocation5 + $0xd8] sm:$0xff]  ;;  %v532_v37 = vpack.c.bf16 %v301_v28, %v299_v27  ;;  %v303_v39 = vld [vmem:[#allocation7 + $0xa0] sm:$0xff] }
  0x4e   :  { %v83_v34 = vld [vmem:[#allocation5 + $0xb0] sm:$0xff]  ;;  %v92_v36 = vld [vmem:[#allocation5 + $0xf8] sm:$0xff]  ;;  %v308_v42 = vld [vmem:[#allocation7 + $0xc8] sm:$0xff] }
  0x4f   :  { %521 = vmatpush1.bf16.msra.mxu0 %v520_v63  ;;  %v305_v40 = vld [vmem:[#allocation7 + $0xb0] sm:$0xff]  ;;  %v310_v43 = vld [vmem:[#allocation7 + $0xd8] sm:$0xff]  ;;  %v307_v10 = vld [vmem:[#allocation7 + $0xc0] sm:$0xff] }
  0x50   :  { %473 = vmatpush1.bf16.msra.mxu1 %v472_v38  ;;  %523 = vmatprep.subr.bf16.mxu0 %v522_v1  ;;  %v534_v38 = vpack.c.bf16 %v306_v31, %v304_v30  ;;  %v87_v44 = vld [vmem:[#allocation5 + $0xd0] sm:$0xff]  ;;  %v96_v46 = vld [vmem:[#allocation5 + $0x118] sm:$0xff]  ;;  %v536_v48 = vpack.c.bf16 %v305_v40, %v303_v39  ;;  %v538_v49 = vpack.c.bf16 %v310_v43, %v308_v42  ;;  %v315_v22 = vld [vmem:[#allocation7 + $0x100] sm:$0xff] }
  0x51   :  { %475 = vmatprep.subr.bf16.mxu1 %v474_v41  ;;  %v492_v41 = vpack.c.bf16 %v83_v34, %v79_v33  ;;  %v91_v45 = vld [vmem:[#allocation5 + $0xf0] sm:$0xff]  ;;  %v100_v47 = vld [vmem:[#allocation5 + $0x138] sm:$0xff]  ;;  %v319_v28 = vld [vmem:[#allocation7 + $0x120] sm:$0xff] }
  0x52   :  { %v496_v50 = vpack.c.bf16 %v91_v45, %v87_v44  ;;  %v498_v51 = vpack.c.bf16 %v100_v47, %v96_v46  ;;  %v95_v52 = vld [vmem:[#allocation5 + $0x110] sm:$0xff]  ;;  %v104_v54 = vld [vmem:[#allocation5 + $0x158] sm:$0xff]  ;;  %v324_v30 = vld [vmem:[#allocation7 + $0x148] sm:$0xff] }
  0x53   :  { %525 = vmatpush1.bf16.msra.mxu0 %v524_v12  ;;  %v108_v55 = vld [vmem:[#allocation5 + $0x178] sm:$0xff]  ;;  %v107_v59 = vld [vmem:[#allocation5 + $0x170] sm:$0xff]  ;;  %v323_v34 = vld [vmem:[#allocation7 + $0x140] sm:$0xff] }
  0x54   :  { %477 = vmatpush1.bf16.msra.mxu1 %v476_v53  ;;  %527 = vmatprep.subr.bf16.mxu0 %v526_v13  ;;  %v99_v53 = vld [vmem:[#allocation5 + $0x130] sm:$0xff]  ;;  %v502_v57 = vpack.c.bf16 %v108_v55, %v104_v54  ;;  %v112_v60 = vld [vmem:[#allocation5 + $0x198] sm:$0xff]  ;;  %v312_v13 = vld [vmem:[#allocation7 + $0xe8] sm:$0xff] }
  0x55   :  { %479 = vmatprep.subr.bf16.mxu1 %v478_v58  ;;  %v500_v56 = vpack.c.bf16 %v99_v53, %v95_v52  ;;  %v103_v58 = vld [vmem:[#allocation5 + $0x150] sm:$0xff]  ;;  %v116_v61 = vld [vmem:[#allocation5 + $0x1b8] sm:$0xff]  ;;  %v327_v40 = vld [vmem:[#allocation7 + $0x160] sm:$0xff] }
  0x56   :  { %v504_v62 = vpack.c.bf16 %v107_v59, %v103_v58  ;;  %v506_v63 = vpack.c.bf16 %v116_v61, %v112_v60  ;;  %v111_v1 = vld [vmem:[#allocation5 + $0x190] sm:$0xff]  ;;  %v120_v3 = vld [vmem:[#allocation5 + $0x1d8] sm:$0xff]  ;;  %v332_v42 = vld [vmem:[#allocation7 + $0x188] sm:$0xff] }
  0x57   :  { %529 = vmatpush1.bf16.msra.mxu0 %v528_v25  ;;  %v115_v2 = vld [vmem:[#allocation5 + $0x1b0] sm:$0xff]  ;;  %v314_v14 = vld [vmem:[#allocation7 + $0xf8] sm:$0xff]  ;;  %v320_v25 = vld [vmem:[#allocation7 + $0x128] sm:$0xff] }
  0x58   :  { %481 = vmatpush1.bf16.msra.mxu1 %v480_v4  ;;  %531 = vmatprep.subr.bf16.mxu0 %v530_v26  ;;  %v124_v4 = vld [vmem:[#allocation5 + $0x1f8] sm:$0xff]  ;;  %v508_v5 = vpack.c.bf16 %v115_v2, %v111_v1  ;;  %v123_v8 = vld [vmem:[#allocation5 + $0x1f0] sm:$0xff]  ;;  %v542_v15 = vpack.c.bf16 %v314_v14, %v312_v13  ;;  %v331_v45 = vld [vmem:[#allocation7 + $0x180] sm:$0xff] }
  0x59   :  { %483 = vmatprep.subr.bf16.mxu1 %v482_v7  ;;  %v510_v6 = vpack.c.bf16 %v124_v4, %v120_v3  ;;  %v119_v7 = vld [vmem:[#allocation5 + $0x1d0] sm:$0xff]  ;;  %v318_v21 = vld [vmem:[#allocation7 + $0x118] sm:$0xff]  ;;  %v336_v47 = vld [vmem:[#allocation7 + $0x1a8] sm:$0xff]  ;;  %v269_v3 = vlaneseq }
  0x5a   :  { %v512_v9 = vpack.c.bf16 %v123_v8, %v119_v7  ;;  %v309_v11 = vld [vmem:[#allocation7 + $0xd0] sm:$0xff]  ;;  %v322_v26 = vld [vmem:[#allocation7 + $0x138] sm:$0xff]  ;;  %v340_v53 = vld [vmem:[#allocation7 + $0x1c8] sm:$0xff] }
  0x5b   :  { %190 = vmatmul.mubr.f32.vlgmr.msra.gmra.mrb[0].mxu1 %v761_v16  ;;  %533 = vmatpush1.bf16.msra.mxu0 %v532_v37  ;;  %v540_v12 = vpack.c.bf16 %v309_v11, %v307_v10  ;;  %v313_v18 = vld [vmem:[#allocation7 + $0xf0] sm:$0xff]  ;;  %v550_v27 = vpack.c.bf16 %v322_v26, %v320_v25  ;;  %v326_v31 = vld [vmem:[#allocation7 + $0x158] sm:$0xff]  ;;  %v344_v60 = vld [vmem:[#allocation7 + $0x1e8] sm:$0xff]  ;;  %v270_v4 = vshrl.u32 %v269_v3, 7 }
  0x5c   :  { %485 = vmatpush1.bf16.msra.mxu1 %v484_v17  ;;  %260 = vmatprep.mubr.f32.mxu1 %v692_v0  ;;  %v494_v0 = vpack.c.bf16 %v92_v36, %v88_v35  ;;  %v311_v17 = vld [vmem:[#allocation7 + $0xe0] sm:$0xff]  ;;  %v317_v24 = vld [vmem:[#allocation7 + $0x110] sm:$0xff]  ;;  %v554_v33 = vpack.c.bf16 %v326_v31, %v324_v30  ;;  %v328_v36 = vld [vmem:[#allocation7 + $0x168] sm:$0xff] }
  0x5d   :  { %487 = vmatprep.subr.bf16.mxu1 %v486_v20  ;;  %535 = vmatprep.subr.bf16.mxu0 %v534_v38  ;;  %v544_v19 = vpack.c.bf16 %v313_v18, %v311_v17  ;;  %v316_v20 = vld [vmem:[#allocation7 + $0x108] sm:$0xff]  ;;  %v325_v35 = vld [vmem:[#allocation7 + $0x150] sm:$0xff]  ;;  %v330_v37 = vld [vmem:[#allocation7 + $0x178] sm:$0xff]  ;;  %v275_v7 = vsub.s32 1, %v270_v4 }
  0x5e   :  { %v546_v23 = vpack.c.bf16 %v318_v21, %v316_v20  ;;  %v556_v38 = vpack.c.bf16 %v325_v35, %v323_v34  ;;  %v558_v39 = vpack.c.bf16 %v330_v37, %v328_v36  ;;  %v334_v43 = vld [vmem:[#allocation7 + $0x198] sm:$0xff]  ;;  %v333_v46 = vld [vmem:[#allocation7 + $0x190] sm:$0xff] }
  0x5f   :  { %537 = vmatpush1.bf16.msra.mxu0 %v536_v48  ;;  %v562_v44 = vpack.c.bf16 %v334_v43, %v332_v42  ;;  %v338_v48 = vld [vmem:[#allocation7 + $0x1b8] sm:$0xff]  ;;  %v337_v52 = vld [vmem:[#allocation7 + $0x1b0] sm:$0xff] }
  0x60   :  { %489 = vmatpush1.bf16.msra.mxu1 %v488_v29  ;;  %539 = vmatprep.subr.bf16.mxu0 %v538_v49  ;;  %v321_v29 = vld [vmem:[#allocation7 + $0x130] sm:$0xff]  ;;  %v564_v49 = vpack.c.bf16 %v333_v46, %v331_v45  ;;  %v342_v54 = vld [vmem:[#allocation7 + $0x1d8] sm:$0xff] }
  0x61   :  { %491 = vmatprep.subr.bf16.mxu1 %v490_v32  ;;  %v552_v32 = vpack.c.bf16 %v321_v29, %v319_v28  ;;  %v341_v58 = vld [vmem:[#allocation7 + $0x1d0] sm:$0xff]  ;;  %v346_v61 = vld [vmem:[#allocation7 + $0x1f8] sm:$0xff] }
  0x62   :  { %v345_v1 = vld [vmem:[#allocation7 + $0x1f0] sm:$0xff]  ;;  %v267_v14 = vld [vmem:[%s786_s2] sm:$0x3] }
  0x63   :  { %541 = vmatpush1.bf16.msra.mxu0 %v540_v12  ;;  %v276_v17 = vrot.slane %v267_v14, %v275_v7 }
  0x64   :  { %493 = vmatpush1.bf16.msra.mxu1 %v492_v41  ;;  %543 = vmatprep.subr.bf16.mxu0 %v542_v15  ;;  %v329_v41 = vld [vmem:[#allocation7 + $0x170] sm:$0xff] }
  0x65   :  { %495 = vmatprep.subr.bf16.mxu1 %v494_v0  ;;  %v560_v0 = vpack.c.bf16 %v329_v41, %v327_v40 }
  0x67   :  { %545 = vmatpush1.bf16.msra.mxu0 %v544_v19 }
  0x68   :  { %497 = vmatpush1.bf16.msra.mxu1 %v496_v50  ;;  %547 = vmatprep.subr.bf16.mxu0 %v546_v23  ;;  %v566_v50 = vpack.c.bf16 %v338_v48, %v336_v47 }
  0x69   :  { %499 = vmatprep.subr.bf16.mxu1 %v498_v51  ;;  %v335_v51 = vld [vmem:[#allocation7 + $0x1a0] sm:$0xff] }
  0x6a   :  { %v568_v55 = vpack.c.bf16 %v337_v52, %v335_v51 }
  0x6c   :  { %501 = vmatpush1.bf16.msra.mxu1 %v500_v56  ;;  %v570_v56 = vpack.c.bf16 %v342_v54, %v340_v53 }
  0x6d   :  { %503 = vmatprep.subr.bf16.mxu1 %v502_v57  ;;  %v339_v57 = vld [vmem:[#allocation7 + $0x1c0] sm:$0xff] }
  0x6e   :  { %v572_v59 = vpack.c.bf16 %v341_v58, %v339_v57 }
  0x70   :  { %505 = vmatpush1.bf16.msra.mxu1 %v504_v62  ;;  %v574_v62 = vpack.c.bf16 %v346_v61, %v344_v60 }
  0x71   :  { %507 = vmatprep.subr.bf16.mxu1 %v506_v63  ;;  %v343_v63 = vld [vmem:[#allocation7 + $0x1e0] sm:$0xff] }
  0x72   :  { %v576_v2 = vpack.c.bf16 %v345_v1, %v343_v63 }
  0x74   :  { %509 = vmatpush1.bf16.msra.mxu1 %v508_v5  ;;  %v271_v5 = vsub.s32 0, %v270_v4 }
  0x75   :  { %511 = vmatprep.subr.bf16.mxu1 %v510_v6  ;;  %v347_v6 = vld [vmem:[%s788_s4] sm:$0x3]  ;;  %s693_s4 = smov [#allocation8]  }
  0x76   :  { %v352_v8 = vrot.slane %v347_v6, %v271_v5  ;;  %v272_v15 = vrot.slane %v267_v14, %v271_v5  ;;  %s440_s9 = sshll.u32 %s693_s4, 4  ;;  %s441_s9 = int_to_ptr.vmem [resolvable:$true] %s440_s9 }
  0x77   :  { %s657_s2 = scalar_lea.vmem %s441_s9, 256  ;;  %p662_p11 = scmp.lt.s32.totalorder %s441_s9, %s441_s9 }
  0x78   :  { %513 = vmatpush1.bf16.msra.mxu1 %v512_v9  ;;  %v356_v9 = vrot.slane %v347_v6, %v275_v7  ;;  %p658_p10 = scmp.ne.s32.totalorder %s441_s9, %s657_s2  ;;  %p663_p12 = scmp.lt.s32.totalorder %s657_s2, %s657_s2 }
  0x7a   :  { %p664_p13 = por %p663_p12, %p662_p11 }
  0x7b   :  { %261 = vmatmul.mubr.f32.vlgmr.msra.gmra.mrb[2].mxu1 %v761_v16  ;;  %v548_v16 = vpack.c.bf16 %v317_v24, %v315_v22 }
  0x7c   :  { %p665_p0 = pnand %p664_p13, %p658_p10 }
  0x7d   :  { %549 = vmatpush1.bf16.msra.mxu0 %v548_v16 }
  0x7e   :  { %551 = vmatprep.subr.bf16.mxu0 %v550_v27 }
  0x81   :  { %553 = vmatpush1.bf16.msra.mxu0 %v552_v32 }
  0x82   :  { %555 = vmatprep.subr.bf16.mxu0 %v554_v33 }
  0x85   :  { %557 = vmatpush1.bf16.msra.mxu0 %v556_v38 }
  0x86   :  { %559 = vmatprep.subr.bf16.mxu0 %v558_v39 }
  0x89   :  { %561 = vmatpush1.bf16.msra.mxu0 %v560_v0 }
  0x8a   :  { %563 = vmatprep.subr.bf16.mxu0 %v562_v44 }
  0x8d   :  { %565 = vmatpush1.bf16.msra.mxu0 %v564_v49 }
  0x8e   :  { %567 = vmatprep.subr.bf16.mxu0 %v566_v50 }
  0x91   :  { %569 = vmatpush1.bf16.msra.mxu0 %v568_v55 }
  0x92   :  { %571 = vmatprep.subr.bf16.mxu0 %v570_v56 }
  0x95   :  { %573 = vmatpush1.bf16.msra.mxu0 %v572_v59 }
  0x96   :  { %575 = vmatprep.subr.bf16.mxu0 %v574_v62 }
  0x99   :  { %577 = vmatpush1.bf16.msra.mxu0 %v576_v2 }
 0x12e   :  { %v191_v10 = vpop.f32.mrb[0].mxu1 }
 0x12f   :  { %v578_v11 = vadd.f32 %v352_v8, %v191_v10  ;;  %v193_v12 = vpop.f32.mrb[1].mxu1 }
 0x130   :  { %v580_v13 = vadd.f32 %v356_v9, %v193_v12 }
 0x14e   :  { %v262_v18 = vpop.f32.mrb[2].mxu1 }
 0x14f   :  { %v279_v19 = vadd.f32 %v272_v15, %v262_v18  ;;  %v264_v20 = vpop.f32.mrb[3].mxu1 }
 0x150   :  { %v280_v21 = vadd.f32 %v276_v17, %v264_v20 }
 0x151   :  { %v281_v23 = vmax.f32 %v279_v19, 0.0 }
 0x152   :  { %v282_v22 = vmax.f32 %v280_v21, 0.0 }
 0x154   :  { %423 = vmatprep.mubr.f32.mxu0 %v282_v22 }
 0x155   :  { %424 = vmatmul.mubr.f32.vlgmr.msra.gmra.mrb[0].mxu0 %v281_v23 }
 0x228   :  { %v425_v24 = vpop.f32.mrb[0].mxu0 }
 0x229   :  { %v579_v25 = vadd.f32 %v578_v11, %v425_v24  ;;  %v427_v26 = vpop.f32.mrb[1].mxu0 }
 0x22a   :  { %v581_v16 = vadd.f32 %v580_v13, %v427_v26 }
 0x22b   :  { %432 = vst [vmem:[#allocation8] sm:$0xff] %v579_v25 }
 0x22c   :  { %433 = vst [vmem:[#allocation8 + $0x8] sm:$0xff] %v581_v16 }
 0x22d   :  { %668 = shalt.err (!%p665_p0)
}
 0x22e   :  { %s669_s12 = scalar_lea.hbm %s789_s5, 256 }
 0x22f   :  { %p670_p1 = scmp.ne.s32.totalorder %s789_s5, %s669_s12  ;;  %p673_p2 = scmp.lt.u32.totalorder %s669_s12, %s789_s5 }
 0x231   :  { %p675_p3 = pnand %p673_p2, %p670_p1 }
 0x233   :  { %678 = shalt.err (!%p675_p3)
}
 0x234   :  { %443 = dma.vmem_to_hbm [thread:$0]  %s441_s9, 256, %s789_s5, [#allocation4]  }
 0x235   :  { %683 = dma.done.wait [#allocation4], 256  }
 0x236   :  { %684 = vsyncadd [#allocation4], 4294967040 }
 0x237   :  { %447 = vsyncpa [#allocation3], 1 }
 0x238   :  { %448 = vsyncpa [#allocation6], 1 }
 0x239   :  { %449 = vsyncpa [#allocation4], 1 }

</bundles_post_ra>
